<compile_context>
chip_gen: v6e
topology: v6e:2x2x1
jax: 0.10.0
libtpu: 0.0.40
codegen_flags: <defaults>
</compile_context>

<pallas_src>
import jax
import jax.numpy as jnp
from jax.experimental import pallas as pl
from jax.experimental.pallas import tpu as pltpu


# ----------------------------- kernel ---------------------------------------


def churn_mlp_kernel(x_ref,
                     w1_ref, t1_ref,
                     w2_ref, t2_ref,
                     w3_ref, t3_ref,
                     w4_ref, b4_ref,
                     o_ref):
    """One batch tile of the fused MLP. Weights have bias+BN pre-folded."""
    cdt = w1_ref.dtype
    # Cast in VMEM (free vs. an extra HBM round trip in the wrapper).
    x = x_ref[...].astype(cdt)                                         # (Bt, 12)

    # layer 1: (fc1 + bn1) -> relu   (dropout = identity in eval mode)
    h = jnp.dot(x, w1_ref[...], preferred_element_type=jnp.float32) + t1_ref[...]
    h = jnp.maximum(h, 0.0)                                            # f32 epilogue

    # layer 2
    h = jnp.dot(h.astype(cdt), w2_ref[...],
                preferred_element_type=jnp.float32) + t2_ref[...]
    h = jnp.maximum(h, 0.0)

    # layer 3
    h = jnp.dot(h.astype(cdt), w3_ref[...],
                preferred_element_type=jnp.float32) + t3_ref[...]
    h = jnp.maximum(h, 0.0)                                            # (Bt, 32) f32

    # layer 4: fc4 (32 -> 1) on VPU + XLU reduce instead of MXU (saves ~25% MXU pushes)
    z = jnp.sum(h * w4_ref[...], axis=-1, keepdims=True) + b4_ref[...]  # (Bt, 1) f32
    p = jax.nn.sigmoid(z)                                              # EUP

    # Lane-dense store: (Bt, 1) -> (1, Bt) via XLU transpose; wrapper reshapes back.
    o_ref[...] = p.T[None].astype(o_ref.dtype)                         # (1, 1, Bt)


# ----------------------------- wrapper ---------------------------------------


def _round_up(n, m):
    return (n + m - 1) // m * m


def prepare_params(params, compute_dtype=jnp.bfloat16, eps=1e-5):
    """Fold Linear bias + eval-mode BatchNorm into the weights once (not per call)."""
    def fold(w, b, gamma, beta, mean, var):
        scale = gamma / jnp.sqrt(var + eps)                 # (F,)
        shift = beta - mean * scale
        w_f = (w * scale[None, :]).astype(compute_dtype)    # scale output columns
        t_f = (b * scale + shift)[None, :].astype(jnp.float32)
        return w_f, t_f

    w1, t1 = fold(params["w1"], params["b1"],
                  params["bn1_g"], params["bn1_b"], params["bn1_m"], params["bn1_v"])
    w2, t2 = fold(params["w2"], params["b2"],
                  params["bn2_g"], params["bn2_b"], params["bn2_m"], params["bn2_v"])
    w3, t3 = fold(params["w3"], params["b3"],
                  params["bn3_g"], params["bn3_b"], params["bn3_m"], params["bn3_v"])
    # Final layer runs on the VPU: keep it f32, stored as a (1, 32) row vector.
    w4 = params["w4"].T.astype(jnp.float32)                 # (1, 32)
    b4 = params["b4"].reshape(1, 1).astype(jnp.float32)     # (1, 1)
    return dict(w1=w1, t1=t1, w2=w2, t2=t2, w3=w3, t3=t3, w4=w4, b4=b4)


def churn_mlp(x, prep, *, b_tile=8192):
    """x: (B, 12) float32. prep: output of prepare_params()."""
    B, F = x.shape

    # Batch tile: multiple of 8 sublanes, clamped to the (rounded-up) batch so small B
    # gives a single un-padded-as-possible tile.  Real VMEM cost is ~3 KiB/row (lane-padded
    # f32 x stream x2 buffers + live f32 intermediates), so 8192 rows ~ 24-28 MiB — under
    # the 48 MiB limit requested below and under v7x's 64 MiB physical VMEM.
    b_tile = max(8, _round_up(min(int(b_tile), B), 8))
    B_pad = _round_up(B, b_tile)
    if B_pad != B:
        # Only the ragged tail is padded; rows [B, B_pad) produce garbage and are sliced off.
        x = jnp.pad(x, ((0, B_pad - B), (0, 0)))
    n_tiles = B_pad // b_tile
    grid = (n_tiles,)                          # strictly 1-D over batch

    def resident(arr):
        # Full-array block + constant index_map -> fetched once, VMEM-resident thereafter.
        return pl.BlockSpec(arr.shape, lambda i: (0,) * arr.ndim)

    # Feature dims kept full-extent (12/128/64/32) — NOT padded to 128 lanes in the spec.
    in_specs = [
        pl.BlockSpec((b_tile, F), lambda i: (i, 0)),   # f32 x stream, double-buffered
        resident(prep["w1"]), resident(prep["t1"]),
        resident(prep["w2"]), resident(prep["t2"]),
        resident(prep["w3"]), resident(prep["t3"]),
        resident(prep["w4"]), resident(prep["b4"]),
    ]
    # Lane-dense output: batch lives on the lane axis of each (1, 1, b_tile) block.
    out_spec = pl.BlockSpec((1, 1, b_tile), lambda i: (i, 0, 0))

    out = pl.pallas_call(
        churn_mlp_kernel,
        out_shape=jax.ShapeDtypeStruct((n_tiles, 1, b_tile), jnp.float32),
        grid=grid,
        in_specs=in_specs,
        out_specs=out_spec,
        compiler_params=pltpu.CompilerParams(
            dimension_semantics=("parallel",),        # shard batch tiles across TCs
            vmem_limit_bytes=48 * 1024 * 1024,        # > 32 MiB scoped default, < v7x 64 MiB
        ),
    )(x, prep["w1"], prep["t1"], prep["w2"], prep["t2"],
      prep["w3"], prep["t3"], prep["w4"], prep["b4"])

    # (n_tiles, 1, b_tile) -> (B_pad, 1): contiguous row-major reshape, free.
    return out.reshape(B_pad, 1)[:B]


# ----------------------------- params / reference ----------------------------


def init_params(key):
    ks = jax.random.split(key, 8)

    def lin(k, fan_in, fan_out):
        # weight stored (in, out); PyTorch Linear weight is (out, in) — transpose convention only.
        bound = 1.0 / jnp.sqrt(fan_in)
        kw, kb = jax.random.split(k)
        w = jax.random.uniform(kw, (fan_in, fan_out), jnp.float32, -bound, bound)
        b = jax.random.uniform(kb, (fan_out,), jnp.float32, -bound, bound)
        return w, b

    w1, b1 = lin(ks[0], 12, 128)
    w2, b2 = lin(ks[1], 128, 64)
    w3, b3 = lin(ks[2], 64, 32)
    w4, b4 = lin(ks[3], 32, 1)

    def bn(k, f):
        k1, k2, k3, k4 = jax.random.split(k, 4)
        gamma = 1.0 + 0.1 * jax.random.normal(k1, (f,), jnp.float32)
        beta = 0.1 * jax.random.normal(k2, (f,), jnp.float32)
        mean = 0.05 * jax.random.normal(k3, (f,), jnp.float32)
        var = 1.0 + 0.1 * jax.random.uniform(k4, (f,), jnp.float32)
        return gamma, beta, mean, var

    bn1_g, bn1_b, bn1_m, bn1_v = bn(ks[4], 128)
    bn2_g, bn2_b, bn2_m, bn2_v = bn(ks[5], 64)
    bn3_g, bn3_b, bn3_m, bn3_v = bn(ks[6], 32)

    return dict(
        w1=w1, b1=b1, w2=w2, b2=b2, w3=w3, b3=b3, w4=w4, b4=b4,
        bn1_g=bn1_g, bn1_b=bn1_b, bn1_m=bn1_m, bn1_v=bn1_v,
        bn2_g=bn2_g, bn2_b=bn2_b, bn2_m=bn2_m, bn2_v=bn2_v,
        bn3_g=bn3_g, bn3_b=bn3_b, bn3_m=bn3_m, bn3_v=bn3_v,
    )


def reference(x, params, eps=1e-5):
    """Pure-JAX f32 reference (eval-mode semantics, un-folded BN)."""
    def bn(h, g, b, m, v):
        return (h - m) / jnp.sqrt(v + eps) * g + b
    h = jax.nn.relu(bn(x @ params["w1"] + params["b1"],
                       params["bn1_g"], params["bn1_b"], params["bn1_m"], params["bn1_v"]))
    h = jax.nn.relu(bn(h @ params["w2"] + params["b2"],
                       params["bn2_g"], params["bn2_b"], params["bn2_m"], params["bn2_v"]))
    h = jax.nn.relu(bn(h @ params["w3"] + params["b3"],
                       params["bn3_g"], params["bn3_b"], params["bn3_m"], params["bn3_v"]))
    return jax.nn.sigmoid(h @ params["w4"] + params["b4"])


# ----------------------------- test ------------------------------------------


if __name__ == "__main__":
    key = jax.random.PRNGKey(0)
    kx, kp = jax.random.split(key)

    B = 50                                     # deliberately not tile-aligned: exercises padding
    x = jax.random.normal(kx, (B, 12), jnp.float32)
    params = init_params(kp)
    ref = reference(x, params)

    # f32 compute path, small tile: tight check of folding, multi-step grid, padding,
    # lane-dense output relayout.
    prep_f32 = prepare_params(params, compute_dtype=jnp.float32)
    out_f32 = jax.block_until_ready(churn_mlp(x, prep_f32, b_tile=16))   # grid = (4,)
    assert out_f32.shape == (B, 1), out_f32.shape
    assert jnp.allclose(out_f32, ref, atol=1e-4, rtol=1e-4), \
        float(jnp.max(jnp.abs(out_f32 - ref)))

    # bf16 compute path with the default (large, auto-clamped) tile: production setting.
    prep_bf16 = prepare_params(params, compute_dtype=jnp.bfloat16)
    out_bf16 = jax.block_until_ready(churn_mlp(x, prep_bf16))            # clamps to 56, grid = (1,)
    assert out_bf16.shape == (B, 1), out_bf16.shape
    assert jnp.allclose(out_bf16, ref, atol=2e-2, rtol=2e-2), \
        float(jnp.max(jnp.abs(out_bf16 - ref)))

    print("KERNEL_OK")
</pallas_src>

<mosaic_0001>
module attributes {stable_mosaic.version = 11 : i64} {
  func.func @churn_mlp_kernel(%arg0: i32, %arg1: memref<16x12xf32, #tpu.memory_space<vmem>>, %arg2: memref<12x128xf32, #tpu.memory_space<vmem>>, %arg3: memref<1x128xf32, #tpu.memory_space<vmem>>, %arg4: memref<128x64xf32, #tpu.memory_space<vmem>>, %arg5: memref<1x64xf32, #tpu.memory_space<vmem>>, %arg6: memref<64x32xf32, #tpu.memory_space<vmem>>, %arg7: memref<1x32xf32, #tpu.memory_space<vmem>>, %arg8: memref<1x32xf32, #tpu.memory_space<vmem>>, %arg9: memref<1x1xf32, #tpu.memory_space<vmem>>, %arg10: memref<1x1x16xf32, #tpu.memory_space<vmem>>) attributes {dimension_semantics = [#tpu.dimension_semantics<parallel>], iteration_bounds = array<i64: 4>, scalar_prefetch = 0 : i64, scratch_operands = 0 : i64, tpu.core_type = #tpu.core_type<tc>, window_params = [{transform_indices = @transform_0, window_bounds = array<i64: 16, 12>}, {pipeline_mode = #tpu.pipeline_mode<synchronous>, transform_indices = @transform_1, window_bounds = array<i64: 12, 128>}, {pipeline_mode = #tpu.pipeline_mode<synchronous>, transform_indices = @transform_2, window_bounds = array<i64: 1, 128>}, {pipeline_mode = #tpu.pipeline_mode<synchronous>, transform_indices = @transform_3, window_bounds = array<i64: 128, 64>}, {pipeline_mode = #tpu.pipeline_mode<synchronous>, transform_indices = @transform_4, window_bounds = array<i64: 1, 64>}, {pipeline_mode = #tpu.pipeline_mode<synchronous>, transform_indices = @transform_5, window_bounds = array<i64: 64, 32>}, {pipeline_mode = #tpu.pipeline_mode<synchronous>, transform_indices = @transform_6, window_bounds = array<i64: 1, 32>}, {pipeline_mode = #tpu.pipeline_mode<synchronous>, transform_indices = @transform_7, window_bounds = array<i64: 1, 32>}, {pipeline_mode = #tpu.pipeline_mode<synchronous>, transform_indices = @transform_8, window_bounds = array<i64: 1, 1>}, {transform_indices = @transform_9, window_bounds = array<i64: 1, 1, 16>}]} {
    %c0 = arith.constant 0 : index
    %c0_0 = arith.constant 0 : index
    %0 = vector.load %arg1[%c0, %c0_0] : memref<16x12xf32, #tpu.memory_space<vmem>>, vector<16x12xf32>
    %c0_1 = arith.constant 0 : index
    %c0_2 = arith.constant 0 : index
    %1 = vector.load %arg2[%c0_1, %c0_2] : memref<12x128xf32, #tpu.memory_space<vmem>>, vector<12x128xf32>
    %cst = arith.constant dense<0.000000e+00> : vector<16x128xf32>
    %2 = tpu.matmul %0, %1, %cst {dimension_numbers = #tpu.dot_dimension_numbers<[1], [0], [0], [1], [0, 0, 1, 1], [], []>} : vector<16x12xf32>, vector<12x128xf32>, vector<16x128xf32> -> vector<16x128xf32>
    %c0_3 = arith.constant 0 : index
    %c0_4 = arith.constant 0 : index
    %3 = vector.load %arg3[%c0_3, %c0_4] : memref<1x128xf32, #tpu.memory_space<vmem>>, vector<1x128xf32>
    %4 = vector.broadcast %3 : vector<1x128xf32> to vector<16x128xf32>
    %5 = arith.addf %2, %4 : vector<16x128xf32>
    %cst_5 = arith.constant 0.000000e+00 : f32
    %6 = vector.broadcast %cst_5 : f32 to vector<16x128xf32>
    %7 = arith.maximumf %5, %6 : vector<16x128xf32>
    %c0_6 = arith.constant 0 : index
    %c0_7 = arith.constant 0 : index
    %8 = vector.load %arg4[%c0_6, %c0_7] : memref<128x64xf32, #tpu.memory_space<vmem>>, vector<128x64xf32>
    %cst_8 = arith.constant dense<0.000000e+00> : vector<16x64xf32>
    %9 = tpu.matmul %7, %8, %cst_8 {dimension_numbers = #tpu.dot_dimension_numbers<[1], [0], [0], [1], [0, 0, 1, 1], [], []>} : vector<16x128xf32>, vector<128x64xf32>, vector<16x64xf32> -> vector<16x64xf32>
    %c0_9 = arith.constant 0 : index
    %c0_10 = arith.constant 0 : index
    %10 = vector.load %arg5[%c0_9, %c0_10] : memref<1x64xf32, #tpu.memory_space<vmem>>, vector<1x64xf32>
    %11 = vector.broadcast %10 : vector<1x64xf32> to vector<16x64xf32>
    %12 = arith.addf %9, %11 : vector<16x64xf32>
    %cst_11 = arith.constant 0.000000e+00 : f32
    %13 = vector.broadcast %cst_11 : f32 to vector<16x64xf32>
    %14 = arith.maximumf %12, %13 : vector<16x64xf32>
    %c0_12 = arith.constant 0 : index
    %c0_13 = arith.constant 0 : index
    %15 = vector.load %arg6[%c0_12, %c0_13] : memref<64x32xf32, #tpu.memory_space<vmem>>, vector<64x32xf32>
    %cst_14 = arith.constant dense<0.000000e+00> : vector<16x32xf32>
    %16 = tpu.matmul %14, %15, %cst_14 {dimension_numbers = #tpu.dot_dimension_numbers<[1], [0], [0], [1], [0, 0, 1, 1], [], []>} : vector<16x64xf32>, vector<64x32xf32>, vector<16x32xf32> -> vector<16x32xf32>
    %c0_15 = arith.constant 0 : index
    %c0_16 = arith.constant 0 : index
    %17 = vector.load %arg7[%c0_15, %c0_16] : memref<1x32xf32, #tpu.memory_space<vmem>>, vector<1x32xf32>
    %18 = vector.broadcast %17 : vector<1x32xf32> to vector<16x32xf32>
    %19 = arith.addf %16, %18 : vector<16x32xf32>
    %cst_17 = arith.constant 0.000000e+00 : f32
    %20 = vector.broadcast %cst_17 : f32 to vector<16x32xf32>
    %21 = arith.maximumf %19, %20 : vector<16x32xf32>
    %c0_18 = arith.constant 0 : index
    %c0_19 = arith.constant 0 : index
    %22 = vector.load %arg8[%c0_18, %c0_19] : memref<1x32xf32, #tpu.memory_space<vmem>>, vector<1x32xf32>
    %23 = vector.broadcast %22 : vector<1x32xf32> to vector<16x32xf32>
    %24 = arith.mulf %21, %23 : vector<16x32xf32>
    %cst_20 = arith.constant dense<0.000000e+00> : vector<16xf32>
    %25 = vector.multi_reduction <add>, %24, %cst_20 [1] : vector<16x32xf32> to vector<16xf32>
    %26 = vector.shape_cast %25 : vector<16xf32> to vector<16x1xf32>
    %c0_21 = arith.constant 0 : index
    %c0_22 = arith.constant 0 : index
    %27 = vector.load %arg9[%c0_21, %c0_22] : memref<1x1xf32, #tpu.memory_space<vmem>>, vector<1x1xf32>
    %28 = vector.broadcast %27 : vector<1x1xf32> to vector<16x1xf32>
    %29 = arith.addf %26, %28 : vector<16x1xf32>
    %30 = arith.negf %29 : vector<16x1xf32>
    %31 = math.exp %30 : vector<16x1xf32>
    %cst_23 = arith.constant 1.000000e+00 : f32
    %32 = vector.broadcast %cst_23 : f32 to vector<16x1xf32>
    %33 = arith.addf %32, %31 : vector<16x1xf32>
    %34 = arith.divf %32, %33 : vector<16x1xf32>
    %35 = tpu.transpose %34, [1, 0] : vector<16x1xf32> -> vector<1x16xf32>
    %36 = vector.shape_cast %35 : vector<1x16xf32> to vector<1x1x16xf32>
    %c0_24 = arith.constant 0 : index
    %c0_25 = arith.constant 0 : index
    %c0_26 = arith.constant 0 : index
    %37 = vector.load %arg10[%c0_24, %c0_25, %c0_26] : memref<1x1x16xf32, #tpu.memory_space<vmem>>, vector<1x1x16xf32>
    tpu.vector_store %arg10[%c0_24, %c0_25, %c0_26], %36 {strides = array<i32>} : memref<1x1x16xf32, #tpu.memory_space<vmem>>, vector<1x1x16xf32>,
    return
  }
  func.func @transform_0(%arg0: i32) -> (i32, i32) {
    %c0_i32 = arith.constant 0 : i32
    %c0_i32_0 = arith.constant 0 : i32
    return %arg0, %c0_i32 : i32, i32
  }
  func.func @transform_1(%arg0: i32) -> (i32, i32) {
    %c0_i32 = arith.constant 0 : i32
    %c0_i32_0 = arith.constant 0 : i32
    %c0_i32_1 = arith.constant 0 : i32
    return %c0_i32, %c0_i32_0 : i32, i32
  }
  func.func @transform_2(%arg0: i32) -> (i32, i32) {
    %c0_i32 = arith.constant 0 : i32
    %c0_i32_0 = arith.constant 0 : i32
    %c0_i32_1 = arith.constant 0 : i32
    return %c0_i32, %c0_i32_0 : i32, i32
  }
  func.func @transform_3(%arg0: i32) -> (i32, i32) {
    %c0_i32 = arith.constant 0 : i32
    %c0_i32_0 = arith.constant 0 : i32
    %c0_i32_1 = arith.constant 0 : i32
    return %c0_i32, %c0_i32_0 : i32, i32
  }
  func.func @transform_4(%arg0: i32) -> (i32, i32) {
    %c0_i32 = arith.constant 0 : i32
    %c0_i32_0 = arith.constant 0 : i32
    %c0_i32_1 = arith.constant 0 : i32
    return %c0_i32, %c0_i32_0 : i32, i32
  }
  func.func @transform_5(%arg0: i32) -> (i32, i32) {
    %c0_i32 = arith.constant 0 : i32
    %c0_i32_0 = arith.constant 0 : i32
    %c0_i32_1 = arith.constant 0 : i32
    return %c0_i32, %c0_i32_0 : i32, i32
  }
  func.func @transform_6(%arg0: i32) -> (i32, i32) {
    %c0_i32 = arith.constant 0 : i32
    %c0_i32_0 = arith.constant 0 : i32
    %c0_i32_1 = arith.constant 0 : i32
    return %c0_i32, %c0_i32_0 : i32, i32
  }
  func.func @transform_7(%arg0: i32) -> (i32, i32) {
    %c0_i32 = arith.constant 0 : i32
    %c0_i32_0 = arith.constant 0 : i32
    %c0_i32_1 = arith.constant 0 : i32
    return %c0_i32, %c0_i32_0 : i32, i32
  }
  func.func @transform_8(%arg0: i32) -> (i32, i32) {
    %c0_i32 = arith.constant 0 : i32
    %c0_i32_0 = arith.constant 0 : i32
    %c0_i32_1 = arith.constant 0 : i32
    return %c0_i32, %c0_i32_0 : i32, i32
  }
  func.func @transform_9(%arg0: i32) -> (i32, i32, i32) {
    %c0_i32 = arith.constant 0 : i32
    %c0_i32_0 = arith.constant 0 : i32
    %c0_i32_1 = arith.constant 0 : i32
    return %arg0, %c0_i32, %c0_i32_0 : i32, i32, i32
  }
}

</mosaic_0001>

<bundles_post_ra>
// kernel: tpu_custom_call.1
= control target key start
LH: loop header
LB: loop body
LE: loop exit
PB: predicated region body
PF: predicated region fallthrough
CT: control target
= control target key end

     0   :  { %s1231_s0 = inlined_call_operand.vmem [shape: f32[64,12], index: 0, kind: input, shape index: {}]   ;;  %s1232_s1 = inlined_call_operand.vmem [shape: f32[12,128], index: 1, kind: input, shape index: {}]   ;;  %s1233_s2 = inlined_call_operand.vmem [shape: f32[1,128], index: 2, kind: input, shape index: {}]   ;;  %s1234_s3 = inlined_call_operand.vmem [shape: f32[128,64], index: 3, kind: input, shape index: {}]   ;;  %s1235_s4 = inlined_call_operand.vmem [shape: f32[1,64], index: 4, kind: input, shape index: {}]   ;;  %s1236_s5 = inlined_call_operand.vmem [shape: f32[64,32], index: 5, kind: input, shape index: {}]   ;;  %s1237_s6 = inlined_call_operand.vmem [shape: f32[1,32], index: 6, kind: input, shape index: {}]   ;;  %s1238_s7 = inlined_call_operand.vmem [shape: f32[1,32], index: 7, kind: input, shape index: {}]   ;;  %s1239_s8 = inlined_call_operand.<no memory space> [shape: f32[1,1], index: 8, kind: input, shape index: {}]   ;;  %s1240_s9 = inlined_call_operand.hbm [shape: f32[4,1,16], index: 9, kind: output, shape index: {}]  }
   0x1   :  { %v14_v0 = vstv %s1239_s8 }
   0x2   :  { %15 = vst [vmem:[#allocation2] sm:$0x1] %v14_v0 }
   0x3   :  { %16 = vsyncpa [#allocation4], 0 }
   0x4   :  { %18 = vsyncpa [#allocation4 + $0x1], 0  ;;  %s1049_s11 = smov 0   ;;  %s1051_s12 = smov 0  }
   0x5   :  { %s1053_s13 = smov 0   ;;  %s1055_s14 = smov 0  }
   0x6 LB: > { %s1070_s8 = sadd.s32 4294967295, %s993_s14   ;;  %s771_s15 = sadd.s32 4294967294, %s993_s14   ;;  %s993_s14 = sphi %s1055_s14, %s1246_s14   ;;  %s989_s13 = sphi %s1053_s13, %s1245_s13   ;;  %s985_s12 = sphi %s1051_s12, %s1244_s12   ;;  %s981_s11 = sphi %s1049_s11, %s1243_s11  }
   0x7   : > { %s1074_s16 = sadd.s32 1, %s993_s14   ;;  %s225_s17 = sadd.s32 1, %s989_s13 }
   0x8   : > { %s222_s18 = ssub.s32 %s993_s14, %s1074_s16  ;;  %p235_p0 = scmp.ne.s32.totalorder %s989_s13, %s985_s12 }
   0x9   : > { %p223_p1 = scmp.eq.s32.totalorder %s222_s18, 0  ;;  %p236_p2 = scmp.eq.s32.totalorder %s1070_s8, 3 }
   0xa   : > { %p241_p3 = scmp.ne.s32.totalorder %s985_s12, %s981_s11  ;;  %p242_p4 = scmp.eq.s32.totalorder %s771_s15, 3 }
   0xb   : > { %s1085_s19 = scalar_select %p223_p1, %s989_s13, %s225_s17  }
   0xc   : > { %p1087_p5 = por %p236_p2, %p235_p0  ;;  %p1091_p6 = por %p242_p4, %p241_p3 }
   0xd   : > { %p774_p7 = scmp.ge.s32.totalorder %s993_s14, 1  ;;  %p293_p8 = scmp.lt.s32.totalorder %s993_s14, 5 }
   0xf   : > { %p294_p9 = pnand %p774_p7, %p293_p8 }
  0x10   : > { %s775_s26 = sshll.u32 (!%p294_p9), %s1070_s8, 1  ;;  %s326_s22 = sand.u32 (!%p294_p9), 1, %s985_s12  }
  0x11   : > { %297 = sbr.rel (%p294_p9) target bundleno = 940 (0x3ac), region = 56  ;;  %p329_p10 = scmp.lt.s32.totalorder (!%p294_p9), %s775_s26, 7 }
  0x12   : > { %s789_s23 = sshll.u32 (!%p294_p9), %s1070_s8, 4  ;;  %s327_s24 = scalar_lea.vmem (!%p294_p9), [#allocation3], %s326_s22 }
  0x13   : > { %s704_s29 = scalar_lea.sflag (!%p294_p9), [#allocation4], %s326_s22  ;;  %s995_s10 = smov (!%p294_p9), [#allocation3]  }
  0x14   : > { %s937_s15 = sshll.u32 (!%p294_p9), %s995_s10, 4  ;;  %s938_s15 = int_to_ptr.vmem [resolvable:$false] %s937_s15 }
  0x15   : > { %s939_s8 = scalar_lea.vmem (!%p294_p9), %s938_s15, 32 }
  0x16   : > { %v337_v1 = vld [vmem:[%s1232_s1 + $0x8] sm:$0xf]  ;;  %vm352_vm0 = vcmask 1043456   ;;  %v336_v2 = vld [vmem:[%s1232_s1] sm:$0xff]  ;;  %v448_v3 = vld [vmem:[%s1234_s3 + $0x78] sm:$0xff]  ;;  %s1248_s26 = smov (!%p329_p10, %s775_s26), 7 }
  0x17   : > { %824 = vmatprep.subr.msk.mxu0 %vm352_vm0, %v337_v1  ;;  %v447_v4 = vld [vmem:[%s1234_s3 + $0x70] sm:$0xff]  ;;  %831 = vmatprep.subr.mxu1 %v448_v3  ;;  %v446_v5 = vld [vmem:[%s1234_s3 + $0x68] sm:$0xff]  ;;  %s776_s17 = sshll.u32 %s1248_s26, 3  ;;  %vm345_vm1 = vcmask 97280   ;;  %v445_v6 = vld [vmem:[%s1234_s3 + $0x60] sm:$0xff]  ;;  %vm548_vm2 = vcmask 523264   ;;  %s1196_s26 = scalar_lea.hbm %s1240_s9, %s789_s23 }
  0x18   : > { %825 = vmatpush3.msk.msra.mxu0 %vm352_vm0, %v337_v1  ;;  %832 = vmatpush3.msra.mxu1 %v448_v3  ;;  %s332_s25 = scalar_lea.vmem %s1231_s0, %s776_s17  ;;  %v444_v9 = vld [vmem:[%s1234_s3 + $0x58] sm:$0xff]  ;;  %v443_v10 = vld [vmem:[%s1234_s3 + $0x50] sm:$0xff]  ;;  %v442_v11 = vld [vmem:[%s1234_s3 + $0x48] sm:$0xff]  ;;  %vm641_vm3 = vcmask 261120   ;;  %vm701_vm4 = vcmask 122880  }
  0x19   : > { %826 = vmatprep.subr.mxu0 %v336_v2  ;;  %833 = vmatprep.subr.mxu1 %v447_v4  ;;  %v334_v7 = vld [vmem:[%s332_s25] sm:$0xff]  ;;  %v335_v8 = vld [vmem:[%s332_s25 + $0x8] sm:$0xff]  ;;  %v440_v13 = vld [vmem:[%s1234_s3 + $0x38] sm:$0xff]  ;;  %s716_s25 = sshll.u32 %s327_s24, 4  ;;  %s717_s25 = int_to_ptr.vmem [resolvable:$true] %s716_s25 }
  0x1a   : > { %827 = vmatpush3.msra.mxu0 %v336_v2  ;;  %834 = vmatpush3.msra.mxu1 %v447_v4  ;;  %v441_v12 = vld [vmem:[%s1234_s3 + $0x40] sm:$0xff]  ;;  %v439_v14 = vld [vmem:[%s1234_s3 + $0x30] sm:$0xff]  ;;  %v438_v15 = vld [vmem:[%s1234_s3 + $0x28] sm:$0xff]  ;;  %s933_s30 = scalar_lea.vmem %s717_s25, 16  ;;  %p940_p0 = scmp.lt.s32.totalorder %s717_s25, %s938_s15 }
  0x1b   : > { %835 = vmatprep.subr.mxu1 %v446_v5  ;;  %828 = vmatprep.mubr.msk.f32.mxu0 %vm345_vm1, %v334_v7  ;;  %v437_v16 = vld [vmem:[%s1234_s3 + $0x20] sm:$0xff]  ;;  %v436_v17 = vld [vmem:[%s1234_s3 + $0x18] sm:$0xff]  ;;  %v435_v18 = vld [vmem:[%s1234_s3 + $0x10] sm:$0xff]  ;;  %p934_p11 = scmp.ne.s32.totalorder %s717_s25, %s933_s30  ;;  %p941_p1 = scmp.lt.s32.totalorder %s939_s8, %s933_s30 }
  0x1c   : > { %836 = vmatpush3.msra.mxu1 %v446_v5  ;;  %829 = vmatmul.mubr.msk.f32.vlgmr.msra.gmra.mxu0 %vm345_vm1, %v335_v8  ;;  %v434_v19 = vld [vmem:[%s1234_s3 + $0x8] sm:$0xff]  ;;  %v433_v20 = vld [vmem:[%s1234_s3] sm:$0xff]  ;;  %v540_v21 = vld [vmem:[%s1236_s5 + $0x38] sm:$0xff] }
  0x1d   : > { %837 = vmatprep.subr.mxu1 %v445_v6  ;;  %v539_v22 = vld [vmem:[%s1236_s5 + $0x30] sm:$0xff]  ;;  %866 = vmatprep.subr.mxu0 %v540_v21  ;;  %v538_v23 = vld [vmem:[%s1236_s5 + $0x28] sm:$0xff]  ;;  %v537_v24 = vld [vmem:[%s1236_s5 + $0x20] sm:$0xff]  ;;  %p935_p12 = pnand %p934_p11, %p1087_p5  ;;  %p942_p2 = por %p941_p1, %p940_p0 }
  0x1e   : > { %838 = vmatpush3.msra.mxu1 %v445_v6  ;;  %867 = vmatpush3.msra.mxu0 %v540_v21  ;;  %v777_v25 = vld [vmem:[%s1233_s2] ss:$0 sm:$0xff]  ;;  %v536_v32 = vld [vmem:[%s1236_s5 + $0x18] sm:$0xff]  ;;  %v535_v33 = vld [vmem:[%s1236_s5 + $0x10] sm:$0xff] }
  0x1f   : > { %839 = vmatprep.subr.mxu1 %v444_v9  ;;  %868 = vmatprep.subr.mxu0 %v539_v22  ;;  %v534_v34 = vld [vmem:[%s1236_s5 + $0x8] sm:$0xff]  ;;  %v533_v35 = vld [vmem:[%s1236_s5] sm:$0xff]  ;;  %p936_p13 = pneg %p935_p12 }
  0x20   : > { %840 = vmatpush3.msra.mxu1 %v444_v9  ;;  %869 = vmatpush3.msra.mxu0 %v539_v22  ;;  %v781_v36 = vld [vmem:[%s1235_s4] ss:$0 sm:$0xff] }
  0x21   : > { %841 = vmatprep.subr.mxu1 %v443_v10  ;;  %870 = vmatprep.subr.mxu0 %v538_v23  ;;  %v782_v43 = vld [vmem:[%s1237_s6] ss:$0 sm:$0xff]  ;;  %p943_p3 = pnand %p942_p2, %p936_p13 }
  0x22   : > { %842 = vmatpush3.msra.mxu1 %v443_v10  ;;  %871 = vmatpush3.msra.mxu0 %v538_v23  ;;  %v785_v50 = vld [vmem:[%s1238_s7] ss:$0 sm:$0xff] }
  0x23   : > { %843 = vmatprep.subr.mxu1 %v442_v11  ;;  %872 = vmatprep.subr.mxu0 %v537_v24  ;;  %v786_v55 = vld [vmem:[#allocation2] ss:$0 sm:$0xff] }
  0x24   : > { %844 = vmatpush3.msra.mxu1 %v442_v11  ;;  %873 = vmatpush3.msra.mxu0 %v537_v24 }
  0x25   : > { %845 = vmatprep.subr.mxu1 %v441_v12  ;;  %874 = vmatprep.subr.mxu0 %v536_v32 }
  0x26   : > { %846 = vmatpush3.msra.mxu1 %v441_v12  ;;  %875 = vmatpush3.msra.mxu0 %v536_v32 }
  0x27   : > { %847 = vmatprep.subr.mxu1 %v440_v13  ;;  %876 = vmatprep.subr.mxu0 %v535_v33 }
  0x28   : > { %848 = vmatpush3.msra.mxu1 %v440_v13  ;;  %877 = vmatpush3.msra.mxu0 %v535_v33 }
  0x29   : > { %849 = vmatprep.subr.mxu1 %v439_v14  ;;  %878 = vmatprep.subr.mxu0 %v534_v34 }
  0x2a   : > { %850 = vmatpush3.msra.mxu1 %v439_v14  ;;  %879 = vmatpush3.msra.mxu0 %v534_v34 }
  0x2b   : > { %851 = vmatprep.subr.mxu1 %v438_v15  ;;  %880 = vmatprep.subr.mxu0 %v533_v35 }
  0x2c   : > { %852 = vmatpush3.msra.mxu1 %v438_v15  ;;  %881 = vmatpush3.msra.mxu0 %v533_v35 }
  0x2d   : > { %853 = vmatprep.subr.mxu1 %v437_v16 }
  0x2e   : > { %854 = vmatpush3.msra.mxu1 %v437_v16 }
  0x2f   : > { %855 = vmatprep.subr.mxu1 %v436_v17 }
  0x30   : > { %856 = vmatpush3.msra.mxu1 %v436_v17 }
  0x31   : > { %857 = vmatprep.subr.mxu1 %v435_v18 }
  0x32   : > { %858 = vmatpush3.msra.mxu1 %v435_v18 }
  0x33   : > { %859 = vmatprep.subr.mxu1 %v434_v19 }
  0x34   : > { %860 = vmatpush3.msra.mxu1 %v434_v19 }
  0x35   : > { %861 = vmatprep.subr.mxu1 %v433_v20 }
  0x36   : > { %862 = vmatpush3.msra.mxu1 %v433_v20 }
  0xdc   : > { %v830_v26 = vpop.f32.mrf.mxu0 }
  0xdd   : > { %v428_v27 = vadd.f32 %v830_v26, %v777_v25 }
  0xde   : > { %v422_v28 = vpop.f32.mrf.mxu0 }
  0xdf   : > { %v423_v29 = vadd.f32 %v777_v25, %v422_v28  ;;  %v432_v31 = vmax.f32 %v428_v27, 0.0 }
  0xe1   : > { %v431_v30 = vmax.f32 %v423_v29, 0.0 }
  0xe3   : > { %863 = vmatprep.mubr.f32.mxu1 %v431_v30 }
  0xe4   : > { %864 = vmatmul.mubr.f32.vlgmr.msra.gmra.mxu1 %v432_v31 }
 0x1a4   : > { %v865_v37 = vpop.f32.mrf.mxu1 }
 0x1a5   : > { %v528_v38 = vadd.f32 %v865_v37, %v781_v36 }
 0x1a6   : > { %v522_v39 = vpop.f32.mrf.mxu1 }
 0x1a7   : > { %v523_v40 = vadd.f32 %v781_v36, %v522_v39  ;;  %v532_v42 = vmax.f32 %v528_v38, 0.0 }
 0x1a9   : > { %v531_v41 = vmax.f32 %v523_v40, 0.0 }
 0x1ab   : > { %882 = vmatprep.mubr.msk.f32.mxu0 %vm548_vm2, %v531_v41 }
 0x1ac   : > { %883 = vmatmul.mubr.msk.f32.vlgmr.msra.gmra.mxu0 %vm548_vm2, %v532_v42 }
 0x26c   : > { %v884_v44 = vpop.f32.mrf.mxu0 }
 0x26d   : > { %v627_v45 = vadd.f32 %v884_v44, %v782_v43 }
 0x26e   : > { %v621_v46 = vpop.f32.mrf.mxu0 }
 0x26f   : > { %v622_v47 = vadd.f32 %v782_v43, %v621_v46  ;;  %v631_v48 = vmax.f32 %v627_v45, 0.0 }
 0x271   : > { %v630_v49 = vmax.f32 %v622_v47, 0.0  ;;  %v640_v53 = vmul.f32 %v785_v50, %v631_v48 }
 0x273   : > { %v639_v51 = vmul.f32 %v785_v50, %v630_v49  ;;  %v645_v54 = vsel %vm641_vm3, %v640_v53, 0.0 }
 0x275   : > { %v642_v52 = vsel %vm641_vm3, %v639_v51, 0.0 }
 0x276   : > { %643 = vadd.xlane.f32.xlu0 %v642_v52 }
 0x27a   : > { %646 = vadd.xlane.f32.xlu0 %v645_v54 }
 0x2ff   : > { %v644_v56 = vpop.xlane.xlu0 %643 }
 0x300   : > { %v655_v57 = vadd.f32 %v786_v55, %v644_v56 }
 0x302   : > { %v787_v58 = vmul.f32 -1.442695, %v655_v57 }
 0x303   : > { %v647_v59 = vpop.xlane.xlu0 %646 }
 0x304   : > { %925 = vpow2.f32 %v787_v58  ;;  %v656_v60 = vadd.f32 %v786_v55, %v647_v59 }
 0x306   : > { %v788_v61 = vmul.f32 -1.442695, %v656_v60 }
 0x308   : > { %927 = vpow2.f32 %v788_v61 }
 0x311   : > { %v926_v62 = vpop.eup %925 }
 0x312   : > { %v663_v63 = vadd.f32 1.0, %v926_v62 }
 0x314   : > { %929 = vrcp.f32 %v663_v63 }
 0x315   : > { %v928_v0 = vpop.eup %927 }
 0x316   : > { %v664_v1 = vadd.f32 1.0, %v928_v0 }
 0x318   : > { %931 = vrcp.f32 %v664_v1 }
 0x321   : > { %v930_v2 = vpop.eup %929 }
 0x322   : > { %669 = vxpose.xlu1.b32.start [1/2] (short) (narrow) %v930_v2, 8 }
 0x325   : > { %v932_v3 = vpop.eup %931 }
 0x326   : > { %670 = vxpose.xlu1.b32.end [2/2] (short) (narrow) %v932_v3, 8 }
 0x39e   : > { %v685_v4 = vpop.trf.xlu1 }
 0x39f   : > { %702 = vst.msk [vmem:[%s327_s24] sm:$0x1] %vm701_vm4, %v685_v4 }
 0x3a0   : > { %946 = shalt.err (!%p943_p3)
}
 0x3a1   : > { %s947_s17 = scalar_lea.hbm %s1196_s26, 16  ;;  %s951_s23 = scalar_lea.hbm %s1240_s9, 64 }
 0x3a2   : > { %p948_p4 = scmp.ne.s32.totalorder %s1196_s26, %s947_s17  ;;  %p952_p9 = scmp.lt.s32.totalorder %s1196_s26, %s1240_s9 }
 0x3a3   : > { %p953_p10 = scmp.lt.s32.totalorder %s951_s23, %s947_s17 }
 0x3a4   : > { %p949_p7 = pnand %p948_p4, %p1087_p5 }
 0x3a5   : > { %p954_p11 = por %p953_p10, %p952_p9 }
 0x3a6   : > { %p950_p8 = pneg %p949_p7 }
 0x3a8   : > { %p955_p12 = pnand %p954_p11, %p950_p8 }
 0x3aa   : > { %958 = shalt.err (!%p955_p12)
}
 0x3ab   : > { %885 = dma.vmem_to_hbm [thread:$0]  (%p1087_p5), %s717_s25, 16, %s1196_s26, %s704_s29  }
 0x3ac PF: > { %p891_p13 = scmp.ge.s32.totalorder %s993_s14, 2  ;;  %s728_s28 = sand.u32 1, %s981_s11  }
 0x3ad   : > { %s729_s30 = scalar_lea.sflag [#allocation4], %s728_s28 }
 0x3ae   : > { %p888_p0 = pnand %p891_p13, %p1091_p6 }
 0x3b0   : > { %p889_p1 = pneg %p888_p0 }
 0x3b2   : > { %976 = dma.done.wait (%p889_p1), %s729_s30, 16  }
 0x3b3   : > { %978 = vsyncadd (%p889_p1), %s729_s30, 4294967280  ;;  %p21_p2 = scmp.ge.s32.totalorder %s1074_s16, 6   ;;  %s1243_s11 = smov %s985_s12 }
 0x3b4   : > { %s1244_s12 = smov %s989_s13  ;;  %s1245_s13 = smov %s1085_s19 }
 0x3b5   : > { %s1246_s14 = smov %s1074_s16  ;;  %23 = sbr.rel (!%p21_p2) target bundleno = 6 (0x6), region = 91 }
 0x3ba   :  { %733 = vsyncpa [#allocation4], 1 }
 0x3bb   :  { %735 = vsyncpa [#allocation4 + $0x1], 1 }

</bundles_post_ra>
